<compile_context>
chip_gen: v7x
topology: tpu7x:2x2x1
jax: 0.10.0
libtpu: 0.0.40
codegen_flags: <defaults>
</compile_context>

<pallas_src>
import functools

import jax
import jax.numpy as jnp
from jax.experimental import pallas as pl
from jax.experimental.pallas import tpu as pltpu


def _tv_loss_kernel(x_ref, coef_ref, o_ref, acc_ref, *, w):
    """One grid step: accumulate masked, pre-scaled squared diffs for a row tile.

    x_ref:    (TN, HW) tile of the (rows, H*W) slab, native dtype.
    coef_ref: (2, HW): row 0 = scale_h * h_valid, row 1 = scale_w * w_valid.
    o_ref:    (8, 128) per-split partial-sum block (same value broadcast).
    acc_ref:  (TN, HW) float32 running elementwise accumulator (VMEM scratch).
    """
    j = pl.program_id(1)

    @pl.when(j == 0)
    def _():
        acc_ref[...] = jnp.zeros_like(acc_ref)

    x = x_ref[...].astype(jnp.float32)  # narrow DMA, f32 math (v5e VPU has no bf16)
    hw = x.shape[1]

    # Full-width neighbour views via lane rotation (XLU slot, stays aligned):
    #   x_h[:, l] = x[:, (l + w) % hw]   vertical neighbour (same image)
    #   x_w[:, l] = x[:, (l + 1) % hw]   horizontal neighbour
    x_h = pltpu.roll(x, shift=hw - w, axis=1)
    x_w = pltpu.roll(x, shift=hw - 1, axis=1)
    dh = x_h - x
    dw = x_w - x

    # coef folds validity mask * (weight*2 / count / batch): wrap lanes and the
    # last image column are zeroed, no vector modulo on the per-element path.
    coef_h = coef_ref[0:1, :]
    coef_w = coef_ref[1:2, :]
    acc_ref[...] += dh * dh * coef_h + dw * dw * coef_w  # pure VALU per step

    # Cross-lane/sublane collapse only once, in the epilogue of this split.
    @pl.when(j == pl.num_programs(1) - 1)
    def _():
        total = jnp.sum(acc_ref[...])
        o_ref[...] = jnp.zeros((8, 128), jnp.float32) + total


def tv_loss(x: jax.Array, tv_loss_weight: float = 1.0) -> jax.Array:
    """Pallas implementation of TVLoss.forward. Returns a float32 scalar."""
    b, c, h, w = x.shape
    hw = h * w
    n = b * c
    count_h = (h - 1) * w
    count_w = h * (w - 1)
    # TODO(synk): degenerate H==1 or W==1 zeroes that term instead of torch's nan.
    scale_h = (2.0 * float(tv_loss_weight) / (count_h * b)) if count_h > 0 else 0.0
    scale_w = (2.0 * float(tv_loss_weight) / (count_w * b)) if count_w > 0 else 0.0

    itemsize = jnp.dtype(x.dtype).itemsize

    # Row-tile: multiple of 8 sublanes, ~2 MiB f32-equivalent per block so the
    # double-buffered inputs + f32 accumulator + temporaries fit v7x's VMEM.
    target_elems = 512 * 1024  # 2 MiB of f32
    tn = max(8, min(512, (target_elems // max(1, hw)) // 8 * 8))
    tn = min(tn, max(8, ((n + 7) // 8) * 8))  # don't over-pad tiny inputs

    # Split the row axis across (up to) two TensorCores when there is enough
    # work; on single-TC chips the extra split is just one tiny extra partial.
    n_splits = 2 if n > tn else 1
    steps = pl.cdiv(n, n_splits * tn)
    n_pad = n_splits * steps * tn

    x2d = x.reshape(n, hw)
    if n_pad > n:
        # Zero rows are whole zero "images": diffs are 0, contribute nothing.
        x2d = jnp.pad(x2d, ((0, n_pad - n), (0, 0)))

    lane = jnp.arange(hw, dtype=jnp.int32)
    h_valid = lane < (hw - w)          # image row index < H-1
    w_valid = (lane % w) < (w - 1)     # image col index < W-1
    coef = jnp.stack([
        jnp.where(h_valid, jnp.float32(scale_h), jnp.float32(0.0)),
        jnp.where(w_valid, jnp.float32(scale_w), jnp.float32(0.0)),
    ]).astype(jnp.float32)             # (2, HW)

    kernel = functools.partial(_tv_loss_kernel, w=w)

    in_block_bytes = tn * hw * itemsize
    acc_bytes = tn * hw * 4
    vmem_limit = int(min(
        48 * 1024 * 1024,
        max(4 * 1024 * 1024,
            2 * in_block_bytes + 8 * acc_bytes + 16 * hw + (1 << 20)),
    ))

    cost = pl.CostEstimate(
        flops=9 * n * hw,
        transcendentals=0,
        bytes_accessed=n_pad * hw * itemsize + 2 * hw * 4 + n_splits * 8 * 128 * 4,
    )

    out = pl.pallas_call(
        kernel,
        out_shape=jax.ShapeDtypeStruct((n_splits * 8, 128), jnp.float32),
        grid_spec=pltpu.PrefetchScalarGridSpec(
            num_scalar_prefetch=0,
            grid=(n_splits, steps),
            in_specs=[
                pl.BlockSpec((tn, hw), lambda i, j: (i * steps + j, 0)),
                pl.BlockSpec((2, hw), lambda i, j: (0, 0)),
            ],
            out_specs=pl.BlockSpec((8, 128), lambda i, j: (i, 0)),
            scratch_shapes=[pltpu.VMEM((tn, hw), jnp.float32)],
        ),
        compiler_params=pltpu.CompilerParams(
            dimension_semantics=("parallel", "arbitrary"),
            vmem_limit_bytes=vmem_limit,
        ),
        cost_estimate=cost,
    )(x2d, coef)

    partials = out.reshape(n_splits, 8, 128)[:, 0, 0]
    return jnp.sum(partials)


if __name__ == "__main__":
    key = jax.random.PRNGKey(0)
    B, C, H, W = 2, 4, 16, 16
    x = jax.random.normal(key, (B, C, H, W), dtype=jnp.float32)

    loss = tv_loss(x, tv_loss_weight=1.0)
    loss = jax.block_until_ready(loss)

    # Correctness check against a plain-JAX port of the torch module.
    count_h = (H - 1) * W
    count_w = H * (W - 1)
    h_tv = jnp.sum((x[:, :, 1:, :] - x[:, :, : H - 1, :]) ** 2)
    w_tv = jnp.sum((x[:, :, :, 1:] - x[:, :, :, : W - 1]) ** 2)
    ref = 1.0 * 2.0 * (h_tv / count_h + w_tv / count_w) / B

    assert loss.shape == ()
    assert jnp.allclose(loss, ref, rtol=1e-5, atol=1e-6), (loss, ref)

    print("KERNEL_OK")
</pallas_src>

<mosaic_0001>
module attributes {stable_mosaic.version = 11 : i64} {
  func.func @_tv_loss_kernel(%arg0: i32, %arg1: i32, %arg2: memref<8x256xf32, #tpu.memory_space<vmem>>, %arg3: memref<2x256xf32, #tpu.memory_space<vmem>>, %arg4: memref<8x128xf32, #tpu.memory_space<vmem>>, %arg5: memref<8x256xf32, #tpu.memory_space<vmem>>) attributes {dimension_semantics = [#tpu.dimension_semantics<parallel>, #tpu.dimension_semantics<arbitrary>], iteration_bounds = array<i64: 1, 1>, scalar_prefetch = 0 : i64, scratch_operands = 1 : i64, tpu.core_type = #tpu.core_type<tc>, window_params = [{transform_indices = @transform_0, window_bounds = array<i64: 8, 256>}, {pipeline_mode = #tpu.pipeline_mode<synchronous>, transform_indices = @transform_1, window_bounds = array<i64: 2, 256>}, {transform_indices = @transform_2, window_bounds = array<i64: 8, 128>}]} {
    %c0_i32 = arith.constant 0 : i32
    %0 = arith.cmpi eq, %arg1, %c0_i32 : i32
    %1 = arith.extui %0 : i1 to i32
    %c0_i32_0 = arith.constant 0 : i32
    %2 = arith.cmpi ne, %1, %c0_i32_0 : i32
    scf.if %2 {
      %cst = arith.constant 0.000000e+00 : f32
      %23 = vector.broadcast %cst : f32 to vector<8x256xf32>
      %c0_11 = arith.constant 0 : index
      %c0_12 = arith.constant 0 : index
      %24 = vector.load %arg5[%c0_11, %c0_12] : memref<8x256xf32, #tpu.memory_space<vmem>>, vector<8x256xf32>
      tpu.vector_store %arg5[%c0_11, %c0_12], %23 {strides = array<i32>} : memref<8x256xf32, #tpu.memory_space<vmem>>, vector<8x256xf32>,
    } else {
    }
    %c0 = arith.constant 0 : index
    %c0_1 = arith.constant 0 : index
    %3 = vector.load %arg2[%c0, %c0_1] : memref<8x256xf32, #tpu.memory_space<vmem>>, vector<8x256xf32>
    %c240_i32 = arith.constant 240 : i32
    %4 = tpu.dynamic_rotate %3 by %c240_i32 dim 1 : vector<8x256xf32>, i32 -> vector<8x256xf32>
    %c255_i32 = arith.constant 255 : i32
    %5 = tpu.dynamic_rotate %3 by %c255_i32 dim 1 : vector<8x256xf32>, i32 -> vector<8x256xf32>
    %6 = arith.subf %4, %3 : vector<8x256xf32>
    %7 = arith.subf %5, %3 : vector<8x256xf32>
    %c0_2 = arith.constant 0 : index
    %c0_3 = arith.constant 0 : index
    %8 = vector.load %arg3[%c0_2, %c0_3] : memref<2x256xf32, #tpu.memory_space<vmem>>, vector<1x256xf32>
    %c1 = arith.constant 1 : index
    %c0_4 = arith.constant 0 : index
    %9 = vector.load %arg3[%c1, %c0_4] : memref<2x256xf32, #tpu.memory_space<vmem>>, vector<1x256xf32>
    %c0_5 = arith.constant 0 : index
    %c0_6 = arith.constant 0 : index
    %10 = vector.load %arg5[%c0_5, %c0_6] : memref<8x256xf32, #tpu.memory_space<vmem>>, vector<8x256xf32>
    %11 = arith.mulf %6, %6 : vector<8x256xf32>
    %12 = vector.broadcast %8 : vector<1x256xf32> to vector<8x256xf32>
    %13 = arith.mulf %11, %12 : vector<8x256xf32>
    %14 = arith.mulf %7, %7 : vector<8x256xf32>
    %15 = vector.broadcast %9 : vector<1x256xf32> to vector<8x256xf32>
    %16 = arith.mulf %14, %15 : vector<8x256xf32>
    %17 = arith.addf %13, %16 : vector<8x256xf32>
    %18 = arith.addf %10, %17 : vector<8x256xf32>
    %c0_7 = arith.constant 0 : index
    %c0_8 = arith.constant 0 : index
    %19 = vector.load %arg5[%c0_7, %c0_8] : memref<8x256xf32, #tpu.memory_space<vmem>>, vector<8x256xf32>
    tpu.vector_store %arg5[%c0_7, %c0_8], %18 {strides = array<i32>} : memref<8x256xf32, #tpu.memory_space<vmem>>, vector<8x256xf32>,
    %c0_i32_9 = arith.constant 0 : i32
    %20 = arith.cmpi eq, %arg1, %c0_i32_9 : i32
    %21 = arith.extui %20 : i1 to i32
    %c0_i32_10 = arith.constant 0 : i32
    %22 = arith.cmpi ne, %21, %c0_i32_10 : i32
    scf.if %22 {
      %c0_11 = arith.constant 0 : index
      %c0_12 = arith.constant 0 : index
      %23 = vector.load %arg5[%c0_11, %c0_12] : memref<8x256xf32, #tpu.memory_space<vmem>>, vector<8x256xf32>
      %24 = vector.shape_cast %23 : vector<8x256xf32> to vector<1x8x256xf32>
      %cst = arith.constant dense<0.000000e+00> : vector<1xf32>
      %25 = vector.multi_reduction <add>, %24, %cst [1, 2] : vector<1x8x256xf32> to vector<1xf32>
      %26 = vector.shape_cast %25 : vector<1xf32> to vector<1x1x1xf32>
      %27 = vector.extract %26[0, 0, 0] : f32 from vector<1x1x1xf32>
      %cst_13 = arith.constant 0.000000e+00 : f32
      %28 = vector.broadcast %cst_13 : f32 to vector<8x128xf32>
      %29 = vector.broadcast %27 : f32 to vector<8x128xf32>
      %30 = arith.addf %28, %29 : vector<8x128xf32>
      %c0_14 = arith.constant 0 : index
      %c0_15 = arith.constant 0 : index
      %31 = vector.load %arg4[%c0_14, %c0_15] : memref<8x128xf32, #tpu.memory_space<vmem>>, vector<8x128xf32>
      tpu.vector_store %arg4[%c0_14, %c0_15], %30 {strides = array<i32>} : memref<8x128xf32, #tpu.memory_space<vmem>>, vector<8x128xf32>,
    } else {
    }
    return
  }
  func.func @transform_0(%arg0: i32, %arg1: i32) -> (i32, i32) {
    %c1_i32 = arith.constant 1 : i32
    %0 = arith.muli %arg0, %c1_i32 : i32
    %1 = arith.addi %0, %arg1 : i32
    %c0_i32 = arith.constant 0 : i32
    %c0_i32_0 = arith.constant 0 : i32
    return %1, %c0_i32 : i32, i32
  }
  func.func @transform_1(%arg0: i32, %arg1: i32) -> (i32, i32) {
    %c0_i32 = arith.constant 0 : i32
    %c0_i32_0 = arith.constant 0 : i32
    %c0_i32_1 = arith.constant 0 : i32
    return %c0_i32, %c0_i32_0 : i32, i32
  }
  func.func @transform_2(%arg0: i32, %arg1: i32) -> (i32, i32) {
    %c0_i32 = arith.constant 0 : i32
    %c0_i32_0 = arith.constant 0 : i32
    return %arg0, %c0_i32 : i32, i32
  }
}

</mosaic_0001>

<bundles_post_ra>
// kernel: tpu_custom_call.1
= control target key start
LH: loop header
LB: loop body
LE: loop exit
PB: predicated region body
PF: predicated region fallthrough
CT: control target
= control target key end

     0   :  { %7 = vsyncpa [#allocation4], 0  ;;  %s279_s0 = inlined_call_operand.hbm [shape: f32[8,256], index: 0, kind: input, shape index: {}]   ;;  %s280_s1 = inlined_call_operand.hbm [shape: f32[2,256], index: 1, kind: input, shape index: {}]   ;;  %s281_s2 = inlined_call_operand.hbm [shape: f32[8,128], index: 2, kind: output, shape index: {}]  }
   0x1   :  { %8 = vsyncpa [#allocation7], 0 }
   0x2   :  { %9 = vsyncpa [#allocation5], 0  ;;  %s223_s9 = smov [#allocation3]   ;;  %s224_s11 = smov [#allocation6]  }
   0x3   :  { %s20_s10 = sshll.u32 %s223_s9, 4  ;;  %s30_s12 = sshll.u32 %s224_s11, 4  ;;  %s21_s10 = int_to_ptr.vmem [resolvable:$true] %s20_s10  ;;  %s31_s12 = int_to_ptr.vmem [resolvable:$true] %s30_s12 }
   0x4   :  { %s151_s15 = scalar_lea.hbm %s279_s0, 256 }
   0x5   :  { %p152_p0 = scmp.ne.s32.totalorder %s279_s0, %s151_s15  ;;  %p155_p1 = scmp.lt.u32.totalorder %s151_s15, %s279_s0 }
   0x7   :  { %p157_p2 = pnand %p155_p1, %p152_p0 }
   0x9   :  { %160 = shalt.err (!%p157_p2)
}
   0xa   :  { %s161_s20 = scalar_lea.vmem %s21_s10, 256  ;;  %p166_p4 = scmp.lt.s32.totalorder %s21_s10, %s21_s10 }
   0xb   :  { %p162_p3 = scmp.ne.s32.totalorder %s21_s10, %s161_s20  ;;  %p167_p5 = scmp.lt.s32.totalorder %s161_s20, %s161_s20 }
   0xd   :  { %p168_p6 = por %p167_p5, %p166_p4 }
   0xf   :  { %p169_p7 = pnand %p168_p6, %p162_p3 }
  0x11   :  { %172 = shalt.err (!%p169_p7)
}
  0x12   :  { %23 = dma.hbm_to_vmem [thread:$0]  %s279_s0, 256, %s21_s10, [#allocation4]  }
  0x13   :  { %s173_s25 = scalar_lea.hbm %s280_s1, 64 }
  0x14   :  { %p174_p8 = scmp.ne.s32.totalorder %s280_s1, %s173_s25  ;;  %p177_p9 = scmp.lt.u32.totalorder %s173_s25, %s280_s1 }
  0x16   :  { %p179_p10 = pnand %p177_p9, %p174_p8 }
  0x18   :  { %182 = shalt.err (!%p179_p10)
}
  0x19   :  { %s183_s30 = scalar_lea.vmem %s31_s12, 64  ;;  %p188_p12 = scmp.lt.s32.totalorder %s31_s12, %s31_s12 }
  0x1a   :  { %p184_p11 = scmp.ne.s32.totalorder %s31_s12, %s183_s30  ;;  %p189_p13 = scmp.lt.s32.totalorder %s183_s30, %s183_s30 }
  0x1c   :  { %p190_p0 = por %p189_p13, %p188_p12 }
  0x1e   :  { %p191_p1 = pnand %p190_p0, %p184_p11 }
  0x20   :  { %194 = shalt.err (!%p191_p1)
}
  0x21   :  { %33 = dma.hbm_to_vmem [thread:$0]  %s280_s1, 64, %s31_s12, [#allocation7]  }
  0x22   :  { %217 = dma.done.wait [#allocation4], 256  }
  0x23   :  { %218 = vsyncadd [#allocation4], 4294967040 }
  0x24   :  { %219 = dma.done.wait [#allocation7], 64  }
  0x25   :  { %220 = vsyncadd [#allocation7], 4294967232  ;;  %v47_v0 = vld [vmem:[#allocation3] sm:$0xff]  ;;  %s225_s4 = smov 127   ;;  %s226_s5 = smov 112   ;;  %v48_v1 = vld [vmem:[#allocation3 + $0x8] sm:$0xff]  ;;  %v53_v2 = vlaneseq }
  0x26   :  { %58 = vrot.lane.b32.xlu1 %v47_v0, %s225_s4  ;;  %49 = vrot.lane.b32.xlu0 %v47_v0, %s226_s5  ;;  %v71_v9 = vld [vmem:[#allocation6 + $0x1] ss:$2 sm:$0x3]  ;;  %v69_v10 = vld [vmem:[#allocation6] ss:$2 sm:$0x3] }
  0x27   :  { %v78_v3 = vshrl.u32 %v53_v2, 7  ;;  %v54_v4 = vand.u32 127, %v53_v2  ;;  %s227_s1 = smov [#allocation8]  }
  0x28   :  { %s134_s6 = sshll.u32 %s227_s1, 4  ;;  %s135_s6 = int_to_ptr.vmem [resolvable:$true] %s134_s6 }
  0x29   :  { %v79_v7 = vsub.s32 0, %v78_v3  ;;  %v83_v8 = vsub.s32 1, %v78_v3  ;;  %vm62_vm0 = vcmp.lt.s32.totalorder %v54_v4, 127  ;;  %vm55_vm1 = vcmp.lt.s32.totalorder %v54_v4, 112  ;;  %s195_s8 = scalar_lea.vmem %s135_s6, 128  ;;  %p200_p3 = scmp.lt.s32.totalorder %s135_s6, %s135_s6 }
  0x2a   :  { %60 = vrot.lane.b32.xlu1 %v48_v1, %s225_s4  ;;  %51 = vrot.lane.b32.xlu0 %v48_v1, %s226_s5  ;;  %p196_p2 = scmp.ne.s32.totalorder %s135_s6, %s195_s8  ;;  %p201_p4 = scmp.lt.s32.totalorder %s195_s8, %s195_s8 }
  0x2b   :  { %v95_v11 = vrot.slane %v71_v9, %v79_v7  ;;  %v99_v12 = vrot.slane %v71_v9, %v83_v8  ;;  %v80_v14 = vrot.slane %v69_v10, %v79_v7  ;;  %v84_v15 = vrot.slane %v69_v10, %v83_v8 }
  0x2c   :  { %p202_p5 = por %p201_p4, %p200_p3 }
  0x2e   :  { %p203_p6 = pnand %p202_p5, %p196_p2 }
  0x98   :  { %v59_v5 = vpop.permute.xlu1 %58  ;;  %v50_v6 = vpop.permute.xlu0 %49 }
  0x9c   :  { %v61_v13 = vpop.permute.xlu1 %60  ;;  %v52_v16 = vpop.permute.xlu0 %51 }
  0x9d   :  { %v63_v17 = vsel %vm62_vm0, %v59_v5, %v61_v13  ;;  %v64_v18 = vsel %vm62_vm0, %v61_v13, %v59_v5  ;;  %v56_v19 = vsel %vm55_vm1, %v50_v6, %v52_v16  ;;  %v57_v20 = vsel %vm55_vm1, %v52_v16, %v50_v6 }
  0x9e   :  { %v67_v21 = vsub.f32 %v63_v17, %v47_v0  ;;  %v68_v22 = vsub.f32 %v64_v18, %v48_v1  ;;  %v65_v23 = vsub.f32 %v56_v19, %v47_v0  ;;  %v66_v24 = vsub.f32 %v57_v20, %v48_v1 }
  0xa0   :  { %v89_v25 = vmul.f32 %v67_v21, %v67_v21  ;;  %v90_v26 = vmul.f32 %v68_v22, %v68_v22  ;;  %v74_v27 = vmul.f32 %v65_v23, %v65_v23  ;;  %v75_v28 = vmul.f32 %v66_v24, %v66_v24 }
  0xa2   :  { %v102_v29 = vmul.f32 %v95_v11, %v89_v25  ;;  %v103_v30 = vmul.f32 %v99_v12, %v90_v26  ;;  %v87_v31 = vmul.f32 %v80_v14, %v74_v27  ;;  %v88_v32 = vmul.f32 %v84_v15, %v75_v28 }
  0xa4   :  { %v104_v33 = vadd.f32 %v102_v29, %v87_v31  ;;  %v105_v34 = vadd.f32 %v103_v30, %v88_v32 }
  0xa6   :  { %v115_v35 = vadd.f32 %v105_v34, %v104_v33 }
  0xa8   :  { %116 = vadd.xlane.f32.xlu0 %v115_v35 }
 0x135   :  { %v117_v36 = vpop.xlane.xlu0 %116 }
 0x136   :  { %v118_v37 = vrot.slane %v117_v36, 4 }
 0x138   :  { %v119_v38 = vadd.f32 %v118_v37, %v117_v36 }
 0x13a   :  { %v120_v39 = vrot.slane %v119_v38, 2 }
 0x13c   :  { %v121_v40 = vadd.f32 %v120_v39, %v119_v38 }
 0x13e   :  { %v122_v41 = vrot.slane %v121_v40, 1 }
 0x140   :  { %v123_v42 = vadd.f32 %v122_v41, %v121_v40 }
 0x142   :  { %144 = vpush %v123_v42 }
 0x173   :  { %s145_s7 = spop %144 }
 0x174   :  { %v125_v43 = vstv %s145_s7 }
 0x175   :  { %127 = vst [vmem:[#allocation8] sm:$0xff] %v125_v43 }
 0x176   :  { %206 = shalt.err (!%p203_p6)
}
 0x177   :  { %s207_s11 = scalar_lea.hbm %s281_s2, 128 }
 0x178   :  { %p208_p7 = scmp.ne.s32.totalorder %s281_s2, %s207_s11  ;;  %p211_p8 = scmp.lt.u32.totalorder %s207_s11, %s281_s2 }
 0x17a   :  { %p213_p9 = pnand %p211_p8, %p208_p7 }
 0x17c   :  { %216 = shalt.err (!%p213_p9)
}
 0x17d   :  { %137 = dma.vmem_to_hbm [thread:$0]  %s135_s6, 128, %s281_s2, [#allocation5]  }
 0x17e   :  { %221 = dma.done.wait [#allocation5], 128  }
 0x17f   :  { %222 = vsyncadd [#allocation5], 4294967168 }
 0x180   :  { %141 = vsyncpa [#allocation4], 1 }
 0x181   :  { %142 = vsyncpa [#allocation7], 1 }
 0x182   :  { %143 = vsyncpa [#allocation5], 1 }

</bundles_post_ra>
